<compile_context>
chip_gen: v7x
topology: tpu7x:2x2x1
jax: 0.10.0
libtpu: 0.0.40
codegen_flags: <defaults>
</compile_context>

<pallas_src>
import functools

import numpy as np
import jax
import jax.numpy as jnp
from jax import lax
from jax.experimental import pallas as pl
from jax.experimental.pallas import tpu as pltpu

REVIN_EPS = 1e-5  # RevIN eps (standard implementation default)


def cosine_beta_schedule(timesteps, s=0.008):
    steps = timesteps + 1
    x = np.linspace(0, timesteps, steps)
    alphas_cumprod = np.cos((x / timesteps + s) / (1 + s) * np.pi * 0.5) ** 2
    alphas_cumprod = alphas_cumprod / alphas_cumprod[0]
    betas = 1 - alphas_cumprod[1:] / alphas_cumprod[:-1]
    return np.clip(betas, 0, 0.999)


def _round_up(a, b):
    return (a + b - 1) // b * b


def _cdiv(a, b):
    return (a + b - 1) // b


# ----------------------------------------------------------------------------
# Kernel: one TM-lane tile of series (lane axis = B*num_vars, sublanes = time).
#   slab_ref  (2*L2+L1, TM) bf16   rows [0:L2]=x, [L2:L2+L1]=cond, rest=noise
#   side_ref  (4, TM) f32          rows [sac*t/T, s1mac*t/T, affw, affb]
#   wxT_ref   (L2, L2) bf16        resident denoiser weight (x branch, transposed)
#   wcT_ref   (L2, L1) bf16        resident denoiser weight (cond branch, transposed)
#   bT_ref    (L2, 1)  f32         resident denoiser bias
#   out_ref   (1, TM)  f32         per-lane sum over time of squared error
# ----------------------------------------------------------------------------
def diffusion_worker_kernel(slab_ref, side_ref, wxT_ref, wcT_ref, bT_ref,
                            out_ref, *, l1, l2, m_total, tm):
    # slab rows land on bf16 sublane-tile boundaries when L1/L2 are multiples of 16.
    xt = slab_ref[0:l2, :].astype(jnp.float32)
    ct = slab_ref[l2:l2 + l1, :].astype(jnp.float32)
    nt = slab_ref[l2 + l1:2 * l2 + l1, :].astype(jnp.float32)

    side = side_ref[...]
    sacp   = side[0:1, :]
    s1macp = side[1:2, :]
    affw   = side[2:3, :]
    affb   = side[3:4, :]

    # ---- RevIN 'norm' on cond_ts (stats over time = sublane axis) -----------
    cmean = jnp.mean(ct, axis=0, keepdims=True)
    cc = ct - cmean
    cvar = jnp.mean(cc * cc, axis=0, keepdims=True)
    inv_cstd = lax.rsqrt(cvar + REVIN_EPS)               # EUP, per-lane row
    cond_n = cc * (inv_cstd * affw) + affb

    # ---- RevIN 'norm' on x (stats reused by the final 'denorm') -------------
    xmean = jnp.mean(xt, axis=0, keepdims=True)
    xc = xt - xmean                                      # reused in the loss
    xvar = jnp.mean(xc * xc, axis=0, keepdims=True)
    inv_xstd = lax.rsqrt(xvar + REVIN_EPS)
    xstd = (xvar + REVIN_EPS) * inv_xstd                 # sqrt via rsqrt*mul
    x_n = xc * (inv_xstd * affw) + affb

    # ---- forward diffusion with t/T folded into the coefficients ------------
    #   tcoef * x_k = (sac*t/T)*x_n + (s1mac*t/T)*noise
    xk_t = sacp * x_n + s1macp * nt

    # ---- synthetic u_net: two small MXU dots, f32 accumulation (no concat) --
    h = jnp.dot(wxT_ref[...], xk_t.astype(jnp.bfloat16),
                preferred_element_type=jnp.float32)
    h = h + jnp.dot(wcT_ref[...], cond_n.astype(jnp.bfloat16),
                    preferred_element_type=jnp.float32)
    h = h + bT_ref[...]

    # ---- RevIN 'denorm' (x's stats) fused with the l2 loss residual ---------
    #   out = (h - affb)/(affw+eps^2)*xstd + xmean ;  d = out - x
    inv_aw = pl.reciprocal(affw + REVIN_EPS * REVIN_EPS, approx=False)
    d = (h - affb) * (inv_aw * xstd) - xc

    # valid-lane mask from iota + static M (no DMA'd mask row)
    lane = (lax.broadcasted_iota(jnp.int32, (1, tm), 1)
            + pl.program_id(0) * tm)
    d = jnp.where(lane < m_total, d, 0.0)
    out_ref[...] = jnp.sum(d * d, axis=0, keepdims=True)


# ----------------------------------------------------------------------------
# Wrapper: plain-JAX glue (single slab build, schedule gathers, packing) + grid
# ----------------------------------------------------------------------------
def diffusion_worker_loss_pallas(x, cond_ts, t, noise, params, *, tm_max=16384):
    B, N, L2 = x.shape
    _, _, L1 = cond_ts.shape
    M = B * N
    R = 2 * L2 + L1

    # Lane tile: multiple of 128, as large as tm_max allows, padding bounded by
    # splitting M evenly over the tile count; keep >= 2 tiles when there is
    # enough work so ('parallel',) can split across v7x's 2 TensorCores.
    g = max(_cdiv(M, tm_max), 1)
    if g < 2 and M > 2 * 128:
        g = 2
    TM = _round_up(_cdiv(M, g), 128)
    Mp = _round_up(M, TM)
    pad = Mp - M
    G = Mp // TM

    # One bf16 slab, lane-dense: time/feature rows on sublanes, series on lanes.
    # Single concat + cast + transpose + pad pass instead of three.
    slab = jnp.concatenate(
        [x.reshape(M, L2), cond_ts.reshape(M, L1), noise.reshape(M, L2)],
        axis=1).astype(jnp.bfloat16).T                              # (R, M)

    num_timesteps = params["sqrt_alphas_cumprod"].shape[0]
    tcoef = t.astype(jnp.float32) / float(num_timesteps)
    sacp = params["sqrt_alphas_cumprod"][t] * tcoef
    s1macp = params["sqrt_one_minus_alphas_cumprod"][t] * tcoef
    # row m = b*N + n  ->  variable index n = m % N
    affw = jnp.tile(params["revin_weight"], B)
    affb = jnp.tile(params["revin_bias"], B)
    side = jnp.stack([sacp, s1macp, affw, affb], axis=0)            # (4, M) f32

    if pad:
        slab = jnp.pad(slab, ((0, 0), (0, pad)))    # zero pad -> finite math
        side = jnp.pad(side, ((0, 0), (0, pad)))

    # resident denoiser parameters (h^T = Wx^T @ xk^T + Wc^T @ cond^T + b^T)
    wxT = params["w_x"].T.astype(jnp.bfloat16)                      # (L2, L2)
    wcT = params["w_c"].T.astype(jnp.bfloat16)                      # (L2, L1)
    bT = params["b_nn"].reshape(L2, 1).astype(jnp.float32)          # (L2, 1)

    kernel = functools.partial(diffusion_worker_kernel,
                               l1=L1, l2=L2, m_total=M, tm=TM)

    partial = pl.pallas_call(
        kernel,
        out_shape=jax.ShapeDtypeStruct((1, Mp), jnp.float32),
        grid=(G,),
        in_specs=[
            pl.BlockSpec((R, TM), lambda i: (0, i)),        # fused x/cond/noise slab
            pl.BlockSpec((4, TM), lambda i: (0, i)),        # packed per-series scalars
            pl.BlockSpec((L2, L2), lambda i: (0, 0)),       # resident weight (x)
            pl.BlockSpec((L2, L1), lambda i: (0, 0)),       # resident weight (cond)
            pl.BlockSpec((L2, 1), lambda i: (0, 0)),        # resident bias
        ],
        out_specs=pl.BlockSpec((1, TM), lambda i: (0, i)),
        compiler_params=pltpu.CompilerParams(
            dimension_semantics=("parallel",),
            vmem_limit_bytes=32 * 1024 * 1024),
    )(slab, side, wxT, wcT, bT)

    # mean over all (M, L2) real elements (padded lanes contribute zero)
    return jnp.sum(partial) / (M * L2)


# ----------------------------------------------------------------------------
# Pure-JAX reference (same math; inputs rounded through bf16 like the kernel)
# ----------------------------------------------------------------------------
def diffusion_worker_loss_ref(x, cond_ts, t, noise, params):
    B, N, L2 = x.shape
    _, _, L1 = cond_ts.shape
    M = B * N
    x2 = x.reshape(M, L2).astype(jnp.bfloat16).astype(jnp.float32)
    c2 = cond_ts.reshape(M, L1).astype(jnp.bfloat16).astype(jnp.float32)
    n2 = noise.reshape(M, L2).astype(jnp.bfloat16).astype(jnp.float32)
    affw = jnp.tile(params["revin_weight"], B)[:, None]
    affb = jnp.tile(params["revin_bias"], B)[:, None]

    cmean = c2.mean(1, keepdims=True)
    cstd = jnp.sqrt(((c2 - cmean) ** 2).mean(1, keepdims=True) + REVIN_EPS)
    c_n = (c2 - cmean) / cstd * affw + affb
    xmean = x2.mean(1, keepdims=True)
    xstd = jnp.sqrt(((x2 - xmean) ** 2).mean(1, keepdims=True) + REVIN_EPS)
    x_n = (x2 - xmean) / xstd * affw + affb

    num_timesteps = params["sqrt_alphas_cumprod"].shape[0]
    tcoef = (t.astype(jnp.float32) / float(num_timesteps))[:, None]
    sacp = params["sqrt_alphas_cumprod"][t][:, None] * tcoef
    s1macp = params["sqrt_one_minus_alphas_cumprod"][t][:, None] * tcoef
    xk_t = sacp * x_n + s1macp * n2          # = (t/T) * x_k

    h = (jnp.dot(xk_t.astype(jnp.bfloat16), params["w_x"].astype(jnp.bfloat16),
                 preferred_element_type=jnp.float32)
         + jnp.dot(c_n.astype(jnp.bfloat16), params["w_c"].astype(jnp.bfloat16),
                   preferred_element_type=jnp.float32)
         + params["b_nn"])

    out = (h - affb) / (affw + REVIN_EPS * REVIN_EPS) * xstd + xmean
    return jnp.mean((out - x2) ** 2)


if __name__ == "__main__":
    # small shapes: batch=2, num_vars=4, seq_len=16, pred_len=16
    B, N, L1, L2 = 2, 4, 16, 16
    DIFF_STEPS = 1000
    M = B * N

    key = jax.random.PRNGKey(0)
    kx, kc, kw1, kw2, kt, kn = jax.random.split(key, 6)

    x = jax.random.normal(kx, (B, N, L2), dtype=jnp.float32)        # target window
    cond_ts = jax.random.normal(kc, (B, N, L1), dtype=jnp.float32)  # conditioning window

    # diffusion noise schedule (cosine), as set_new_noise_schedule does
    betas = cosine_beta_schedule(DIFF_STEPS)
    alphas_cumprod = np.cumprod(1.0 - betas, axis=0)

    params = dict(
        sqrt_alphas_cumprod=jnp.asarray(np.sqrt(alphas_cumprod), jnp.float32),
        sqrt_one_minus_alphas_cumprod=jnp.asarray(
            np.sqrt(1.0 - alphas_cumprod), jnp.float32),
        # RevIN affine params (PyTorch init: weight=ones, bias=zeros)
        revin_weight=jnp.ones((N,), jnp.float32),
        revin_bias=jnp.zeros((N,), jnp.float32),
        # synthetic u_net parameters (deterministic init)
        w_x=0.1 * jax.random.normal(kw1, (L2, L2), dtype=jnp.float32),
        w_c=0.1 * jax.random.normal(kw2, (L1, L2), dtype=jnp.float32),
        b_nn=jnp.zeros((1, L2), jnp.float32),
    )

    # t = cat([randint(0, T, M//2), T-1-that]) ; noise = randn_like(x)
    t_half = jax.random.randint(kt, (M // 2,), 0, DIFF_STEPS)
    t = jnp.concatenate([t_half, DIFF_STEPS - 1 - t_half], axis=0)
    noise = jax.random.normal(kn, (M, L2), dtype=jnp.float32)

    loss = diffusion_worker_loss_pallas(x, cond_ts, t, noise, params)
    jax.block_until_ready(loss)

    ref = diffusion_worker_loss_ref(x, cond_ts, t, noise, params)
    assert abs(float(loss) - float(ref)) <= 1e-3 * max(1.0, abs(float(ref))), (
        float(loss), float(ref))
    print("KERNEL_OK")
</pallas_src>

<mosaic_0001>
module attributes {stable_mosaic.version = 11 : i64} {
  func.func @diffusion_worker_kernel(%arg0: i32, %arg1: memref<48x128xbf16, #tpu.memory_space<vmem>>, %arg2: memref<4x128xf32, #tpu.memory_space<vmem>>, %arg3: memref<16x16xbf16, #tpu.memory_space<vmem>>, %arg4: memref<16x16xbf16, #tpu.memory_space<vmem>>, %arg5: memref<16x1xf32, #tpu.memory_space<vmem>>, %arg6: memref<1x128xf32, #tpu.memory_space<vmem>>) attributes {dimension_semantics = [#tpu.dimension_semantics<parallel>], iteration_bounds = array<i64: 1>, scalar_prefetch = 0 : i64, scratch_operands = 0 : i64, tpu.core_type = #tpu.core_type<tc>, window_params = [{transform_indices = @transform_0, window_bounds = array<i64: 48, 128>}, {transform_indices = @transform_1, window_bounds = array<i64: 4, 128>}, {pipeline_mode = #tpu.pipeline_mode<synchronous>, transform_indices = @transform_2, window_bounds = array<i64: 16, 16>}, {pipeline_mode = #tpu.pipeline_mode<synchronous>, transform_indices = @transform_3, window_bounds = array<i64: 16, 16>}, {pipeline_mode = #tpu.pipeline_mode<synchronous>, transform_indices = @transform_4, window_bounds = array<i64: 16, 1>}, {transform_indices = @transform_5, window_bounds = array<i64: 1, 128>}]} {
    %c0 = arith.constant 0 : index
    %c0_0 = arith.constant 0 : index
    %0 = vector.load %arg1[%c0, %c0_0] : memref<48x128xbf16, #tpu.memory_space<vmem>>, vector<16x128xbf16>
    %1 = arith.extf %0 : vector<16x128xbf16> to vector<16x128xf32>
    %c16 = arith.constant 16 : index
    %c0_1 = arith.constant 0 : index
    %2 = vector.load %arg1[%c16, %c0_1] : memref<48x128xbf16, #tpu.memory_space<vmem>>, vector<16x128xbf16>
    %3 = arith.extf %2 : vector<16x128xbf16> to vector<16x128xf32>
    %c32 = arith.constant 32 : index
    %c0_2 = arith.constant 0 : index
    %4 = vector.load %arg1[%c32, %c0_2] : memref<48x128xbf16, #tpu.memory_space<vmem>>, vector<16x128xbf16>
    %5 = arith.extf %4 : vector<16x128xbf16> to vector<16x128xf32>
    %c0_3 = arith.constant 0 : index
    %c0_4 = arith.constant 0 : index
    %6 = vector.load %arg2[%c0_3, %c0_4] : memref<4x128xf32, #tpu.memory_space<vmem>>, vector<4x128xf32>
    %7 = vector.extract_strided_slice %6 {offsets = [0, 0], sizes = [1, 128], strides = [1, 1]} : vector<4x128xf32> to vector<1x128xf32>
    %8 = vector.extract_strided_slice %6 {offsets = [1, 0], sizes = [1, 128], strides = [1, 1]} : vector<4x128xf32> to vector<1x128xf32>
    %9 = vector.extract_strided_slice %6 {offsets = [2, 0], sizes = [1, 128], strides = [1, 1]} : vector<4x128xf32> to vector<1x128xf32>
    %10 = vector.extract_strided_slice %6 {offsets = [3, 0], sizes = [1, 128], strides = [1, 1]} : vector<4x128xf32> to vector<1x128xf32>
    %cst = arith.constant dense<0.000000e+00> : vector<128xf32>
    %11 = vector.multi_reduction <add>, %3, %cst [0] : vector<16x128xf32> to vector<128xf32>
    %12 = vector.shape_cast %11 : vector<128xf32> to vector<1x128xf32>
    %cst_5 = arith.constant 1.600000e+01 : f32
    %13 = vector.broadcast %cst_5 : f32 to vector<1x128xf32>
    %14 = arith.divf %12, %13 : vector<1x128xf32>
    %15 = vector.broadcast %14 : vector<1x128xf32> to vector<16x128xf32>
    %16 = arith.subf %3, %15 : vector<16x128xf32>
    %17 = arith.mulf %16, %16 : vector<16x128xf32>
    %cst_6 = arith.constant dense<0.000000e+00> : vector<128xf32>
    %18 = vector.multi_reduction <add>, %17, %cst_6 [0] : vector<16x128xf32> to vector<128xf32>
    %19 = vector.shape_cast %18 : vector<128xf32> to vector<1x128xf32>
    %cst_7 = arith.constant 1.600000e+01 : f32
    %20 = vector.broadcast %cst_7 : f32 to vector<1x128xf32>
    %21 = arith.divf %19, %20 : vector<1x128xf32>
    %cst_8 = arith.constant 9.99999974E-6 : f32
    %22 = vector.broadcast %cst_8 : f32 to vector<1x128xf32>
    %23 = arith.addf %21, %22 : vector<1x128xf32>
    %24 = math.rsqrt %23 : vector<1x128xf32>
    %25 = arith.mulf %24, %9 : vector<1x128xf32>
    %26 = vector.broadcast %25 : vector<1x128xf32> to vector<16x128xf32>
    %27 = arith.mulf %16, %26 : vector<16x128xf32>
    %28 = vector.broadcast %10 : vector<1x128xf32> to vector<16x128xf32>
    %29 = arith.addf %27, %28 : vector<16x128xf32>
    %cst_9 = arith.constant dense<0.000000e+00> : vector<128xf32>
    %30 = vector.multi_reduction <add>, %1, %cst_9 [0] : vector<16x128xf32> to vector<128xf32>
    %31 = vector.shape_cast %30 : vector<128xf32> to vector<1x128xf32>
    %cst_10 = arith.constant 1.600000e+01 : f32
    %32 = vector.broadcast %cst_10 : f32 to vector<1x128xf32>
    %33 = arith.divf %31, %32 : vector<1x128xf32>
    %34 = vector.broadcast %33 : vector<1x128xf32> to vector<16x128xf32>
    %35 = arith.subf %1, %34 : vector<16x128xf32>
    %36 = arith.mulf %35, %35 : vector<16x128xf32>
    %cst_11 = arith.constant dense<0.000000e+00> : vector<128xf32>
    %37 = vector.multi_reduction <add>, %36, %cst_11 [0] : vector<16x128xf32> to vector<128xf32>
    %38 = vector.shape_cast %37 : vector<128xf32> to vector<1x128xf32>
    %cst_12 = arith.constant 1.600000e+01 : f32
    %39 = vector.broadcast %cst_12 : f32 to vector<1x128xf32>
    %40 = arith.divf %38, %39 : vector<1x128xf32>
    %cst_13 = arith.constant 9.99999974E-6 : f32
    %41 = vector.broadcast %cst_13 : f32 to vector<1x128xf32>
    %42 = arith.addf %40, %41 : vector<1x128xf32>
    %43 = math.rsqrt %42 : vector<1x128xf32>
    %cst_14 = arith.constant 9.99999974E-6 : f32
    %44 = vector.broadcast %cst_14 : f32 to vector<1x128xf32>
    %45 = arith.addf %40, %44 : vector<1x128xf32>
    %46 = arith.mulf %45, %43 : vector<1x128xf32>
    %47 = arith.mulf %43, %9 : vector<1x128xf32>
    %48 = vector.broadcast %47 : vector<1x128xf32> to vector<16x128xf32>
    %49 = arith.mulf %35, %48 : vector<16x128xf32>
    %50 = vector.broadcast %10 : vector<1x128xf32> to vector<16x128xf32>
    %51 = arith.addf %49, %50 : vector<16x128xf32>
    %52 = vector.broadcast %7 : vector<1x128xf32> to vector<16x128xf32>
    %53 = arith.mulf %52, %51 : vector<16x128xf32>
    %54 = vector.broadcast %8 : vector<1x128xf32> to vector<16x128xf32>
    %55 = arith.mulf %54, %5 : vector<16x128xf32>
    %56 = arith.addf %53, %55 : vector<16x128xf32>
    %c0_15 = arith.constant 0 : index
    %c0_16 = arith.constant 0 : index
    %57 = vector.load %arg3[%c0_15, %c0_16] : memref<16x16xbf16, #tpu.memory_space<vmem>>, vector<16x16xbf16>
    %58 = arith.truncf %56 : vector<16x128xf32> to vector<16x128xbf16>
    %cst_17 = arith.constant dense<0.000000e+00> : vector<16x128xf32>
    %59 = tpu.matmul %57, %58, %cst_17 {dimension_numbers = #tpu.dot_dimension_numbers<[1], [0], [0], [1], [0, 0, 1, 1], [], []>} : vector<16x16xbf16>, vector<16x128xbf16>, vector<16x128xf32> -> vector<16x128xf32>
    %c0_18 = arith.constant 0 : index
    %c0_19 = arith.constant 0 : index
    %60 = vector.load %arg4[%c0_18, %c0_19] : memref<16x16xbf16, #tpu.memory_space<vmem>>, vector<16x16xbf16>
    %61 = arith.truncf %29 : vector<16x128xf32> to vector<16x128xbf16>
    %cst_20 = arith.constant dense<0.000000e+00> : vector<16x128xf32>
    %62 = tpu.matmul %60, %61, %cst_20 {dimension_numbers = #tpu.dot_dimension_numbers<[1], [0], [0], [1], [0, 0, 1, 1], [], []>} : vector<16x16xbf16>, vector<16x128xbf16>, vector<16x128xf32> -> vector<16x128xf32>
    %63 = arith.addf %59, %62 : vector<16x128xf32>
    %c0_21 = arith.constant 0 : index
    %c0_22 = arith.constant 0 : index
    %64 = vector.load %arg5[%c0_21, %c0_22] : memref<16x1xf32, #tpu.memory_space<vmem>>, vector<16x1xf32>
    %65 = vector.broadcast %64 : vector<16x1xf32> to vector<16x128xf32>
    %66 = arith.addf %63, %65 : vector<16x128xf32>
    %cst_23 = arith.constant 1.000000e-10 : f32
    %67 = vector.broadcast %cst_23 : f32 to vector<1x128xf32>
    %68 = arith.addf %9, %67 : vector<1x128xf32>
    %69 = tpu.reciprocal %68 : vector<1x128xf32> -> vector<1x128xf32>
    %70 = vector.broadcast %10 : vector<1x128xf32> to vector<16x128xf32>
    %71 = arith.subf %66, %70 : vector<16x128xf32>
    %72 = arith.mulf %69, %46 : vector<1x128xf32>
    %73 = vector.broadcast %72 : vector<1x128xf32> to vector<16x128xf32>
    %74 = arith.mulf %71, %73 : vector<16x128xf32>
    %75 = arith.subf %74, %35 : vector<16x128xf32>
    %76 = tpu.iota {dimensions = array<i32: 1>} : vector<1x128xi32>
    %c128_i32 = arith.constant 128 : i32
    %77 = arith.muli %arg0, %c128_i32 : i32
    %78 = vector.broadcast %77 : i32 to vector<1x128xi32>
    %79 = arith.addi %76, %78 : vector<1x128xi32>
    %c8_i32 = arith.constant 8 : i32
    %80 = vector.broadcast %c8_i32 : i32 to vector<1x128xi32>
    %81 = arith.cmpi slt, %79, %80 : vector<1x128xi32>
    %cst_24 = arith.constant 0.000000e+00 : f32
    %82 = vector.shape_cast %81 : vector<1x128xi1> to vector<1x128xi1>
    %83 = vector.broadcast %82 : vector<1x128xi1> to vector<16x128xi1>
    %84 = vector.broadcast %cst_24 : f32 to vector<16x128xf32>
    %85 = arith.select %83, %75, %84 : vector<16x128xi1>, vector<16x128xf32>
    %86 = arith.mulf %85, %85 : vector<16x128xf32>
    %cst_25 = arith.constant dense<0.000000e+00> : vector<128xf32>
    %87 = vector.multi_reduction <add>, %86, %cst_25 [0] : vector<16x128xf32> to vector<128xf32>
    %88 = vector.shape_cast %87 : vector<128xf32> to vector<1x128xf32>
    %c0_26 = arith.constant 0 : index
    %c0_27 = arith.constant 0 : index
    %89 = vector.load %arg6[%c0_26, %c0_27] : memref<1x128xf32, #tpu.memory_space<vmem>>, vector<1x128xf32>
    tpu.vector_store %arg6[%c0_26, %c0_27], %88 {strides = array<i32>} : memref<1x128xf32, #tpu.memory_space<vmem>>, vector<1x128xf32>,
    return
  }
  func.func @transform_0(%arg0: i32) -> (i32, i32) {
    %c0_i32 = arith.constant 0 : i32
    %c0_i32_0 = arith.constant 0 : i32
    return %c0_i32, %arg0 : i32, i32
  }
  func.func @transform_1(%arg0: i32) -> (i32, i32) {
    %c0_i32 = arith.constant 0 : i32
    %c0_i32_0 = arith.constant 0 : i32
    return %c0_i32, %arg0 : i32, i32
  }
  func.func @transform_2(%arg0: i32) -> (i32, i32) {
    %c0_i32 = arith.constant 0 : i32
    %c0_i32_0 = arith.constant 0 : i32
    %c0_i32_1 = arith.constant 0 : i32
    return %c0_i32, %c0_i32_0 : i32, i32
  }
  func.func @transform_3(%arg0: i32) -> (i32, i32) {
    %c0_i32 = arith.constant 0 : i32
    %c0_i32_0 = arith.constant 0 : i32
    %c0_i32_1 = arith.constant 0 : i32
    return %c0_i32, %c0_i32_0 : i32, i32
  }
  func.func @transform_4(%arg0: i32) -> (i32, i32) {
    %c0_i32 = arith.constant 0 : i32
    %c0_i32_0 = arith.constant 0 : i32
    %c0_i32_1 = arith.constant 0 : i32
    return %c0_i32, %c0_i32_0 : i32, i32
  }
  func.func @transform_5(%arg0: i32) -> (i32, i32) {
    %c0_i32 = arith.constant 0 : i32
    %c0_i32_0 = arith.constant 0 : i32
    return %c0_i32, %arg0 : i32, i32
  }
}

</mosaic_0001>

<bundles_post_ra>
// kernel: tpu_custom_call.1
= control target key start
LH: loop header
LB: loop body
LE: loop exit
PB: predicated region body
PF: predicated region fallthrough
CT: control target
= control target key end

     0   :  { %10 = vsyncpa [#allocation3], 0  ;;  %s484_s0 = inlined_call_operand.hbm [shape: bf16[48,128], index: 0, kind: input, shape index: {}]   ;;  %s485_s1 = inlined_call_operand.vmem [shape: f32[4,128], index: 1, kind: input, shape index: {}]   ;;  %s486_s2 = inlined_call_operand.vmem [shape: bf16[16,16], index: 2, kind: input, shape index: {}]   ;;  %s487_s3 = inlined_call_operand.vmem [shape: bf16[16,16], index: 3, kind: input, shape index: {}]   ;;  %s488_s4 = inlined_call_operand.vmem [shape: f32[16,1], index: 4, kind: input, shape index: {}]   ;;  %s489_s5 = inlined_call_operand.hbm [shape: f32[1,128], index: 5, kind: output, shape index: {}]  }
   0x1   :  { %11 = vsyncpa [#allocation4], 0  ;;  %s396_s18 = smov [#allocation2]   ;;  %s348_s22 = scalar_lea.hbm %s484_s0, 384 }
   0x2   :  { %s17_s19 = sshll.u32 %s396_s18, 4  ;;  %p349_p0 = scmp.ne.s32.totalorder %s484_s0, %s348_s22  ;;  %s18_s19 = int_to_ptr.vmem [resolvable:$true] %s17_s19 }
   0x3   :  { %p352_p1 = scmp.lt.u32.totalorder %s348_s22, %s484_s0 }
   0x5   :  { %p354_p2 = pnand %p352_p1, %p349_p0 }
   0x7   :  { %357 = shalt.err (!%p354_p2)
}
   0x8   :  { %s358_s27 = scalar_lea.vmem %s18_s19, 384  ;;  %p363_p4 = scmp.lt.s32.totalorder %s18_s19, %s18_s19 }
   0x9   :  { %p359_p3 = scmp.ne.s32.totalorder %s18_s19, %s358_s27  ;;  %p364_p5 = scmp.lt.s32.totalorder %s358_s27, %s358_s27 }
   0xb   :  { %p365_p6 = por %p364_p5, %p363_p4 }
   0xd   :  { %p366_p7 = pnand %p365_p6, %p359_p3 }
   0xf   :  { %369 = shalt.err (!%p366_p7)
}
  0x10   :  { %s397_s28 = smov 64   ;;  %s398_s29 = smov 4  }
  0x11   :  { %23 = dma.hbm_to_vmem [thread:$0]  %s484_s0, 384, %s18_s19, [#allocation3], %s397_s28, %s397_s28, %s398_s29  }
  0x12   :  { %392 = dma.done.wait [#allocation3], 384  }
  0x13   :  { %393 = vsyncadd [#allocation3], 4294966912  ;;  %v399_v0 = vmov 0.0   ;;  %vm400_vm0 = vmmov 0   ;;  %v401_v1 = vmov 0   ;;  %v314_v2 = vld [vmem:[#allocation2 + $0x8] sm:$0xff]   ;;  %v73_v52 = vlaneseq }
  0x14   :  { %320 = vmatprep.subr.bf16.mxu0 %v399_v0  ;;  %322 = vmatprep.mubr.msk.bf16.mxu0 %vm400_vm0, %v399_v0  ;;  %v308_v3 = vunpack.c.l.bf16 %v314_v2  ;;  %v309_v4 = vunpack.c.h.bf16 %v314_v2  ;;  %v303_v5 = vld [vmem:[#allocation2] sm:$0xff]   ;;  %v237_v12 = vld [vmem:[%s488_s4 + $0x8] sm:$0xff]  ;;  %v315_v61 = vld [vmem:[#allocation2 + $0x10] sm:$0xff]   ;;  %vm142_vm1 = vcmask 130048  }
  0x15   :  { %326 = vmatprep.subr.bf16.mxu1 %v399_v0  ;;  %328 = vmatprep.mubr.msk.bf16.mxu1 %vm400_vm0, %v399_v0  ;;  %v304_v6 = vunpack.c.l.bf16 %v303_v5  ;;  %v305_v7 = vunpack.c.h.bf16 %v303_v5  ;;  %v236_v9 = vld [vmem:[%s488_s4] sm:$0xff]  ;;  %v74_v53 = vshrl.u32 %v73_v52, 7  ;;  %v312_v2 = vunpack.c.l.bf16 %v315_v61 }
  0x16   :  { %339 = vset.pattern.permute.xlu0 %v401_v1  ;;  %v49_v8 = vadd.f32 %v309_v4, %v308_v3  ;;  %v48_v54 = vld [vmem:[%s485_s1] sm:$0xf] }
  0x17   :  { %v85_v10 = vadd.f32 %v305_v7, %v304_v6  ;;  %240 = vperm.xlu0 %339, %v236_v9   ;;  %v75_v55 = vsub.s32 2, %v74_v53  ;;  %v81_v56 = vsub.s32 3, %v74_v53  ;;  %v125_v58 = vsub.s32 1, %v74_v53 }
  0x18   :  { %v50_v11 = vrot.slane %v49_v8, 4  ;;  %v119_v63 = vsub.s32 0, %v74_v53 }
  0x19   :  { %v86_v13 = vrot.slane %v85_v10, 4  ;;  %v82_v1 = vrot.slane %v48_v54, %v81_v56  ;;  %v126_v5 = vrot.slane %v48_v54, %v125_v58 }
  0x1a   :  { %v51_v14 = vadd.f32 %v50_v11, %v49_v8 }
  0x1b   :  { %v87_v15 = vadd.f32 %v86_v13, %v85_v10  ;;  %245 = vperm.xlu0 %339, %v237_v12   ;;  %v120_v10 = vrot.slane %v48_v54, %v119_v63 }
  0x1c   :  { %v52_v16 = vrot.slane %v51_v14, 2 }
  0x1d   :  { %v88_v17 = vrot.slane %v87_v15, 2 }
  0x1e   :  { %v53_v18 = vadd.f32 %v52_v16, %v51_v14 }
  0x1f   :  { %v89_v19 = vadd.f32 %v88_v17, %v87_v15  ;;  %v127_v15 = vmul.f32 %v312_v2, %v126_v5 }
  0x20   :  { %v54_v20 = vrot.slane %v53_v18, 1 }
  0x21   :  { %v90_v21 = vrot.slane %v89_v19, 1 }
  0x22   :  { %v55_v22 = vadd.f32 %v54_v20, %v53_v18  ;;  %v340_v18 = vld [vmem:[%s487_s3] sm:$0xff]  }
  0x23   :  { %v91_v23 = vadd.f32 %v90_v21, %v89_v19 }
  0x24   :  { %v57_v24 = vmul.f32 0.0625, %v55_v22 }
  0x25   :  { %v92_v25 = vmul.f32 0.0625, %v91_v23 }
  0x26   :  { %v58_v26 = vsub.f32 %v308_v3, %v57_v24  ;;  %v59_v27 = vsub.f32 %v309_v4, %v57_v24  ;;  %v313_v3 = vunpack.c.h.bf16 %v315_v61  ;;  %v341_v24 = vld [vmem:[%s486_s2] sm:$0xff]   ;;  %s402_s2 = smov [#allocation5]  }
  0x27   :  { %v451_v28 = vsub.f32 %v304_v6, %v92_v25  ;;  %v453_v29 = vsub.f32 %v305_v7, %v92_v25  ;;  %v250_v25 = vadd.f32 1e-10, %v48_v54  ;;  %s289_s3 = sshll.u32 %s402_s2, 4  ;;  %s290_s3 = int_to_ptr.vmem [resolvable:$true] %s289_s3 }
  0x28   :  { %v60_v30 = vmul.f32 %v58_v26, %v58_v26  ;;  %v61_v31 = vmul.f32 %v59_v27, %v59_v27  ;;  %v128_v16 = vmul.f32 %v313_v3, %v126_v5  ;;  %s370_s14 = scalar_lea.vmem %s290_s3, 16  ;;  %s374_s15 = scalar_lea.vmem %s290_s3, 32 }
  0x29   :  { %v95_v32 = vmul.f32 %v451_v28, %v451_v28  ;;  %v96_v33 = vmul.f32 %v453_v29, %v453_v29  ;;  %p371_p8 = scmp.ne.s32.totalorder %s290_s3, %s370_s14  ;;  %p375_p9 = scmp.lt.s32.totalorder %s290_s3, %s290_s3 }
  0x2a   :  { %v62_v34 = vadd.f32 %v61_v31, %v60_v30  ;;  %p376_p10 = scmp.lt.s32.totalorder %s374_s15, %s370_s14 }
  0x2b   :  { %v97_v35 = vadd.f32 %v96_v33, %v95_v32 }
  0x2c   :  { %v63_v36 = vrot.slane %v62_v34, 4  ;;  %p377_p11 = por %p376_p10, %p375_p9 }
  0x2d   :  { %v98_v37 = vrot.slane %v97_v35, 4 }
  0x2e   :  { %v64_v38 = vadd.f32 %v63_v36, %v62_v34  ;;  %p378_p12 = pnand %p377_p11, %p371_p8 }
  0x2f   :  { %v99_v39 = vadd.f32 %v98_v37, %v97_v35 }
  0x30   :  { %v65_v40 = vrot.slane %v64_v38, 2 }
  0x31   :  { %v100_v41 = vrot.slane %v99_v39, 2 }
  0x32   :  { %v66_v42 = vadd.f32 %v65_v40, %v64_v38 }
  0x33   :  { %v101_v43 = vadd.f32 %v100_v41, %v99_v39 }
  0x34   :  { %v67_v44 = vrot.slane %v66_v42, 1 }
  0x35   :  { %v102_v45 = vrot.slane %v101_v43, 1 }
  0x36   :  { %v68_v46 = vadd.f32 %v67_v44, %v66_v42 }
  0x37   :  { %v103_v47 = vadd.f32 %v102_v45, %v101_v43  ;;  %v264_v45 = vand.u32 127, %v73_v52 }
  0x38   :  { %v69_v48 = vmul.f32 0.0625, %v68_v46 }
  0x39   :  { %v104_v49 = vmul.f32 0.0625, %v103_v47  ;;  %vm268_vm2 = vcmp.lt.s32.totalorder %v264_v45, 8 }
  0x3a   :  { %v70_v50 = vadd.f32 1e-05, %v69_v48 }
  0x3b   :  { %v105_v51 = vadd.f32 1e-05, %v104_v49 }
  0x3c   :  { %342 = vrsqrt.f32 %v70_v50 }
  0x3d   :  { %344 = vrsqrt.f32 %v105_v51 }
  0x3e   :  { %346 = vrcp.f32 %v250_v25 }
  0x46   :  { %v343_v57 = vpop.eup %342 }
  0x47   :  { %v345_v59 = vpop.eup %344  ;;  %v72_v60 = vmul.f32 %v343_v57, %v48_v54 }
  0x48   :  { %v108_v62 = vmul.f32 %v345_v59, %v48_v54  ;;  %v347_v30 = vpop.eup %346 }
  0x49   :  { %v76_v0 = vrot.slane %v72_v60, %v75_v55 }
  0x4a   :  { %v112_v4 = vrot.slane %v108_v62, %v75_v55 }
  0x4b   :  { %v77_v6 = vmul.f32 %v76_v0, %v58_v26  ;;  %v78_v7 = vmul.f32 %v76_v0, %v59_v27  ;;  %v107_v27 = vmul.f32 %v345_v59, %v105_v51 }
  0x4c   :  { %v113_v8 = vmul.f32 %v112_v4, %v451_v28  ;;  %v114_v9 = vmul.f32 %v112_v4, %v453_v29 }
  0x4d   :  { %v83_v11 = vadd.f32 %v82_v1, %v77_v6  ;;  %v84_v12 = vadd.f32 %v82_v1, %v78_v7  ;;  %v254_v35 = vmul.f32 %v347_v30, %v107_v27 }
  0x4e   :  { %v115_v13 = vadd.f32 %v113_v8, %v82_v1  ;;  %v116_v14 = vadd.f32 %v114_v9, %v82_v1 }
  0x4f   :  { %v136_v17 = vpack.c.bf16 %v84_v12, %v83_v11  ;;  %v258_v41 = vrot.slane %v254_v35, %v75_v55 }
  0x50   :  { %v121_v19 = vmul.f32 %v120_v10, %v115_v13  ;;  %v122_v20 = vmul.f32 %v120_v10, %v116_v14 }
  0x51   :  { %321 = vmatpush3.bf16.msra.mxu0 %v136_v17 }
  0x52   :  { %v129_v21 = vadd.f32 %v127_v15, %v121_v19  ;;  %v130_v22 = vadd.f32 %v128_v16, %v122_v20 }
  0x54   :  { %323 = vmatmul.mubr.msk.bf16.vlgmr.msra.gmra.mrb[0].mxu0 %vm142_vm1, %v340_v18  ;;  %v133_v23 = vpack.c.bf16 %v130_v22, %v129_v21 }
  0x56   :  { %327 = vmatpush3.bf16.msra.mxu1 %v133_v23 }
  0x59   :  { %329 = vmatmul.mubr.msk.bf16.vlgmr.msra.gmra.mrb[0].mxu1 %vm142_vm1, %v341_v24 }
  0x96   :  { %v241_v33 = vpop.permute.xlu0 %240 }
  0x9a   :  { %v246_v44 = vpop.permute.xlu0 %245 }
 0x127   :  { %v180_v26 = vpop.f32.mrb[0].mxu0 }
 0x128   :  { %v324_v31 = vpop.f32.mrb[1].mxu0 }
 0x129   :  { %v183_v32 = vpop.f32.mrb[2].mxu0 }
 0x12a   :  { %v325_v34 = vpop.f32.mrb[3].mxu0 }
 0x12c   :  { %v229_v36 = vpop.f32.mrb[0].mxu1 }
 0x12d   :  { %v230_v37 = vadd.f32 %v229_v36, %v180_v26  ;;  %v330_v38 = vpop.f32.mrb[1].mxu1 }
 0x12e   :  { %v232_v39 = vpop.f32.mrb[2].mxu1 }
 0x12f   :  { %v248_v40 = vadd.f32 %v241_v33, %v230_v37  ;;  %v233_v42 = vadd.f32 %v232_v39, %v183_v32  ;;  %v331_v43 = vpop.f32.mrb[3].mxu1 }
 0x131   :  { %v252_v46 = vsub.f32 %v248_v40, %v82_v1  ;;  %v249_v47 = vadd.f32 %v246_v44, %v233_v42 }
 0x133   :  { %v259_v48 = vmul.f32 %v258_v41, %v252_v46  ;;  %v253_v49 = vsub.f32 %v249_v47, %v82_v1 }
 0x135   :  { %v261_v50 = vsub.f32 %v259_v48, %v451_v28  ;;  %v260_v51 = vmul.f32 %v258_v41, %v253_v49 }
 0x137   :  { %v271_v53 = vsel %vm268_vm2, %v261_v50, 0.0  ;;  %v262_v54 = vsub.f32 %v260_v51, %v453_v29 }
 0x138   :  { %v273_v57 = vmul.f32 %v271_v53, %v271_v53 }
 0x139   :  { %v272_v56 = vsel %vm268_vm2, %v262_v54, 0.0 }
 0x13a   :  { %v274_v58 = vmul.f32 %v272_v56, %v272_v56 }
 0x13c   :  { %v275_v59 = vadd.f32 %v274_v58, %v273_v57 }
 0x13e   :  { %v276_v55 = vrot.slane %v275_v59, 4 }
 0x140   :  { %v277_v60 = vadd.f32 %v276_v55, %v275_v59 }
 0x142   :  { %v278_v61 = vrot.slane %v277_v60, 2 }
 0x144   :  { %v279_v62 = vadd.f32 %v278_v61, %v277_v60 }
 0x146   :  { %v280_v52 = vrot.slane %v279_v62, 1 }
 0x148   :  { %v281_v63 = vadd.f32 %v280_v52, %v279_v62 }
 0x14a   :  { %282 = vst [vmem:[#allocation5] sm:$0x1] %v281_v63 }
 0x14b   :  { %381 = shalt.err (!%p378_p12)
}
 0x14c   :  { %s382_s18 = scalar_lea.hbm %s489_s5, 16 }
 0x14d   :  { %p383_p13 = scmp.ne.s32.totalorder %s489_s5, %s382_s18  ;;  %p386_p0 = scmp.lt.u32.totalorder %s382_s18, %s489_s5 }
 0x14f   :  { %p388_p1 = pnand %p386_p0, %p383_p13 }
 0x151   :  { %391 = shalt.err (!%p388_p1)
}
 0x152   :  { %292 = dma.vmem_to_hbm [thread:$0]  %s290_s3, 16, %s489_s5, [#allocation4]  }
 0x153   :  { %394 = dma.done.wait [#allocation4], 16  }
 0x154   :  { %395 = vsyncadd [#allocation4], 4294967280 }
 0x155   :  { %296 = vsyncpa [#allocation3], 1 }
 0x156   :  { %297 = vsyncpa [#allocation4], 1 }

</bundles_post_ra>
